<compile_context>
chip_gen: v7x
topology: tpu7x:2x2x1
jax: 0.10.0
libtpu: 0.0.40
codegen_flags: <defaults>
</compile_context>

<pallas_src>
import functools

import jax
import jax.numpy as jnp
from jax.experimental import pallas as pl
from jax.experimental.pallas import tpu as pltpu

SMALL_BATCH = 16  # matches `SmallBatch = 16` in the reference script


def bn2d_kernel(x_ref, gamma_ref, beta_ref, out_ref, *, n_small, hw_valid, thres):
    """BN2d hot path on one (N, C_tile, HW_pad) channel-major tile.

    x_ref:     (N, C_tile, HW_pad) f32   (pad lanes, if any, hold zeros)
    gamma_ref: (1, C_tile, 1)      f32
    beta_ref:  (1, C_tile, 1)      f32
    out_ref:   (N, C_tile, HW_pad) f32
    """
    x = x_ref[...]
    gamma = gamma_ref[...]
    beta = beta_ref[...]

    hw_pad = x.shape[2]
    m_small = n_small * hw_valid
    small_denom = max(m_small - 1, 1)  # torch.var unbiased (n-1); guard n==1

    def persum(v):
        # Batch-axis (VALU) reduce first, lane-axis (XLU) reduce last:
        # one cross-lane reduction per channel tile instead of N.
        return jnp.sum(jnp.sum(v, axis=0, keepdims=True), axis=-1, keepdims=True)

    # Lane-validity mask (only materialized when HW was padded to 128*k).
    if hw_valid < hw_pad:
        lane = jax.lax.broadcasted_iota(jnp.int32, x.shape, 2)
        valid = lane < hw_valid
    else:
        valid = None

    # ---- small-batch mean (pad lanes are zero -> contribute 0 to the sum) ----
    s_mean = persum(x[:n_small]) / m_small

    xc = x - s_mean

    # ---- small-batch unbiased variance (small slice only, no full-tile temp) --
    xc_small = xc[:n_small]
    if valid is not None:
        xsq_small = jnp.where(valid[:n_small], xc_small * xc_small, 0.0)
    else:
        xsq_small = xc_small * xc_small
    s_var = persum(xsq_small) / small_denom

    # ---- outlier selection via per-channel bounds (no per-element divide) ----
    # |x - s_mean| < thres * sigma  <=>  -thres < (x - s_mean)/sigma < thres
    thr = thres * jnp.sqrt(s_var + 1e-10)
    sel = jnp.abs(xc) < thr
    if valid is not None:
        sel = jnp.logical_and(sel, valid)

    # ---- one-pass moments over selected elements (shifted by s_mean) ---------
    mxc = jnp.where(sel, xc, 0.0)
    cnt = persum(sel.astype(jnp.float32))
    s1 = persum(mxc)
    s2 = persum(mxc * xc)
    # Guard the degenerate all-rejected channel (the reference would NaN here).
    cnt = jnp.maximum(cnt, 1.0)
    dmean_c = s1 / cnt
    dvar = jnp.maximum(s2 / cnt - dmean_c * dmean_c, 0.0)
    dmean = s_mean + dmean_c

    # ---- folded affine: out = x * scale + bias (pure VPU per element) --------
    scale = gamma * jax.lax.rsqrt(dvar + 1e-20)
    bias = beta - dmean * scale
    out_ref[...] = x * scale + bias


def _tpu_vmem_capacity_bytes():
    """Trace-time VMEM capacity query; falls back to 128 MiB (v5e/v6e)."""
    try:
        info = pltpu.get_tpu_info()
        cap = getattr(info, "vmem_capacity_bytes", None)
        if cap:
            return int(cap)
    except Exception:
        pass
    return 128 * 1024 * 1024


def _pick_channel_tile(n, c, hw_pad, target_tile_bytes):
    """Channel-tile (sublane dim of the block) selection.

    Constraints honored:
      * c_tile is a multiple of 8 OR equals the full C (Mosaic (8,128) rule).
      * one (N, c_tile, HW_pad) f32 block stays under `target_tile_bytes` when
        at all possible (never returns an over-budget multiple-of-8 tile; the
        grid uses pl.cdiv so c_tile need not divide C — the trailing padded
        block is benign because stats are per-channel and OOB writes are
        discarded).
      * when C >= 16 the grid has length >= 2 so megacore ("parallel") can
        shard channels across v7x's two TensorCores.
    """
    per_channel_bytes = n * hw_pad * 4
    if c <= 8 or (c < 16 and c * per_channel_bytes <= target_tile_bytes):
        # Full-C block (block dim == array dim is always layout-legal).
        # TODO(synk): if even this exceeds VMEM (huge N*H*W), a tiled-HW path
        # with scratch accumulators is needed; not implemented.
        return c
    units = max(1, target_tile_bytes // (8 * per_channel_bytes))  # 8-chan units
    c_units = (c + 7) // 8
    units = min(units, c_units)
    if c >= 16:
        units = min(units, max(1, (c_units + 1) // 2))  # grid length >= 2
    return 8 * units


def bn2d_forward(x_nchw, gamma, beta, thres=3.0):
    """JAX wrapper reproducing BN2d.forward for an NCHW float input."""
    N, C, H, W = x_nchw.shape
    HW = H * W
    n_small = min(N, SMALL_BATCH)  # xorig[:SmallBatch] clips like torch

    # Free layout glue: reshape only, no HBM transpose.
    x3 = x_nchw.reshape(N, C, HW).astype(jnp.float32)
    g3 = jnp.asarray(gamma, jnp.float32).reshape(1, C, 1)
    b3 = jnp.asarray(beta, jnp.float32).reshape(1, C, 1)

    # Lane-dense stores: pad HW to a multiple of 128 when needed.  The pad
    # costs one extra HBM round trip in XLA but keeps every kernel store an
    # unmasked, full-vreg vst; pad lanes (zeros) are masked out of all stats.
    hw_pad = ((HW + 127) // 128) * 128
    if hw_pad != HW:
        x3 = jnp.pad(x3, ((0, 0), (0, 0), (0, hw_pad - HW)))

    # Generation-aware block budget: v7x-class (64 MiB VMEM per TC) gets
    # smaller blocks; v5e/v6e (128 MiB) keep large blocks to amortize the
    # ~0.35 us per-grid-step overhead.
    vmem_cap = _tpu_vmem_capacity_bytes()
    if vmem_cap <= 96 * 1024 * 1024:
        target_tile_bytes = (5 * 1024 * 1024) // 2  # ~2.5 MiB on v7x
    else:
        target_tile_bytes = 4 * 1024 * 1024         # 4 MiB on v5e/v6e
    vmem_limit = min(48 * 1024 * 1024, (vmem_cap * 3) // 4)

    c_tile = _pick_channel_tile(N, C, hw_pad, target_tile_bytes)
    grid = (pl.cdiv(C, c_tile),)

    kernel = functools.partial(
        bn2d_kernel, n_small=n_small, hw_valid=HW, thres=float(thres)
    )

    cost = pl.CostEstimate(
        flops=int(13 * N * C * hw_pad),
        transcendentals=int(2 * C),
        bytes_accessed=int(2 * N * C * hw_pad * 4 + 4 * C * 4),
    )

    out3 = pl.pallas_call(
        kernel,
        out_shape=jax.ShapeDtypeStruct((N, C, hw_pad), jnp.float32),
        grid=grid,
        in_specs=[
            pl.BlockSpec((N, c_tile, hw_pad), lambda c: (0, c, 0)),
            pl.BlockSpec((1, c_tile, 1), lambda c: (0, c, 0)),
            pl.BlockSpec((1, c_tile, 1), lambda c: (0, c, 0)),
        ],
        out_specs=pl.BlockSpec((N, c_tile, hw_pad), lambda c: (0, c, 0)),
        compiler_params=pltpu.CompilerParams(
            dimension_semantics=("parallel",),
            vmem_limit_bytes=vmem_limit,
        ),
        cost_estimate=cost,
    )(x3, g3, b3)

    # Drop pad lanes (if any) and reshape back to NCHW — layout glue only.
    if hw_pad != HW:
        out3 = out3[:, :, :HW]
    return out3.reshape(N, C, H, W)


def bn2d_reference(x, gamma, beta, thres=3.0):
    """Pure-jnp port of BN2d.forward (two-pass math) for a tolerance check."""
    N, C, H, W = x.shape
    n_small = min(N, SMALL_BATCH)
    xs = jnp.transpose(x[:n_small], (1, 0, 2, 3)).reshape(C, -1)
    s_mean = jnp.mean(xs, axis=-1).reshape(1, C, 1, 1)
    s_var = jnp.var(xs, axis=-1, ddof=1).reshape(1, C, 1, 1)
    normalized = (x - s_mean) / jnp.sqrt(s_var + 1e-10)
    sel = jnp.logical_and(normalized < thres, normalized > -thres).astype(jnp.float32)
    cnt = jnp.sum(sel, axis=(0, 2, 3))
    dmean = (jnp.sum(x * sel, axis=(0, 2, 3)) / cnt).reshape(1, C, 1, 1)
    dvar = (jnp.sum(((x - dmean) ** 2) * sel, axis=(0, 2, 3)) / cnt).reshape(1, C, 1, 1)
    g = jnp.asarray(gamma, jnp.float32).reshape(1, C, 1, 1)
    b = jnp.asarray(beta, jnp.float32).reshape(1, C, 1, 1)
    return g * (x - dmean) / jnp.sqrt(dvar + 1e-20) + b


if __name__ == "__main__":
    key = jax.random.PRNGKey(0)
    k1, k2 = jax.random.split(key)

    # --- Test 1: HW already a multiple of 128 (lane-dense as-is) -------------
    N, C, H, W = 2, 4, 16, 16
    x = jax.random.normal(k1, (N, C, H, W), dtype=jnp.float32) * 2.0 + 0.5
    gamma = jnp.ones((C,), jnp.float32)   # BN2d.__init__ defaults
    beta = jnp.zeros((C,), jnp.float32)

    out = bn2d_forward(x, gamma, beta, thres=3.0)
    jax.block_until_ready(out)
    assert out.shape == (N, C, H, W) and out.dtype == jnp.float32
    ref = bn2d_reference(x, gamma, beta, thres=3.0)
    assert jnp.allclose(out, ref, rtol=1e-3, atol=1e-3), float(
        jnp.max(jnp.abs(out - ref))
    )

    # --- Test 2: non-multiple-of-128 HW (pad+mask path) with a large mean ----
    # offset (stresses the one-pass shifted moments) and non-trivial affine.
    N2, C2, H2, W2 = 4, 8, 8, 8
    x2 = jax.random.normal(k2, (N2, C2, H2, W2), dtype=jnp.float32) * 3.0 + 50.0
    gamma2 = jnp.linspace(0.5, 1.5, C2, dtype=jnp.float32)
    beta2 = jnp.linspace(-1.0, 1.0, C2, dtype=jnp.float32)

    out2 = bn2d_forward(x2, gamma2, beta2, thres=3.0)
    jax.block_until_ready(out2)
    assert out2.shape == (N2, C2, H2, W2) and out2.dtype == jnp.float32
    ref2 = bn2d_reference(x2, gamma2, beta2, thres=3.0)
    assert jnp.allclose(out2, ref2, rtol=2e-3, atol=2e-3), float(
        jnp.max(jnp.abs(out2 - ref2))
    )

    print("KERNEL_OK")
</pallas_src>

<mosaic_0001>
module attributes {stable_mosaic.version = 11 : i64} {
  func.func @bn2d_kernel(%arg0: i32, %arg1: memref<2x4x256xf32, #tpu.memory_space<vmem>>, %arg2: memref<1x4x1xf32, #tpu.memory_space<vmem>>, %arg3: memref<1x4x1xf32, #tpu.memory_space<vmem>>, %arg4: memref<2x4x256xf32, #tpu.memory_space<vmem>>) attributes {dimension_semantics = [#tpu.dimension_semantics<parallel>], iteration_bounds = array<i64: 1>, scalar_prefetch = 0 : i64, scratch_operands = 0 : i64, tpu.core_type = #tpu.core_type<tc>, window_params = [{transform_indices = @transform_0, window_bounds = array<i64: 2, 4, 256>}, {transform_indices = @transform_1, window_bounds = array<i64: 1, 4, 1>}, {transform_indices = @transform_2, window_bounds = array<i64: 1, 4, 1>}, {transform_indices = @transform_3, window_bounds = array<i64: 2, 4, 256>}]} {
    %c0 = arith.constant 0 : index
    %c0_0 = arith.constant 0 : index
    %c0_1 = arith.constant 0 : index
    %0 = vector.load %arg1[%c0, %c0_0, %c0_1] : memref<2x4x256xf32, #tpu.memory_space<vmem>>, vector<2x4x256xf32>
    %c0_2 = arith.constant 0 : index
    %c0_3 = arith.constant 0 : index
    %c0_4 = arith.constant 0 : index
    %1 = vector.load %arg2[%c0_2, %c0_3, %c0_4] : memref<1x4x1xf32, #tpu.memory_space<vmem>>, vector<1x4x1xf32>
    %c0_5 = arith.constant 0 : index
    %c0_6 = arith.constant 0 : index
    %c0_7 = arith.constant 0 : index
    %2 = vector.load %arg3[%c0_5, %c0_6, %c0_7] : memref<1x4x1xf32, #tpu.memory_space<vmem>>, vector<1x4x1xf32>
    %cst = arith.constant dense<0.000000e+00> : vector<4x256xf32>
    %3 = vector.multi_reduction <add>, %0, %cst [0] : vector<2x4x256xf32> to vector<4x256xf32>
    %4 = vector.shape_cast %3 : vector<4x256xf32> to vector<1x4x256xf32>
    %cst_8 = arith.constant dense<0.000000e+00> : vector<1x4xf32>
    %5 = vector.multi_reduction <add>, %4, %cst_8 [2] : vector<1x4x256xf32> to vector<1x4xf32>
    %6 = vector.shape_cast %5 : vector<1x4xf32> to vector<1x4x1xf32>
    %cst_9 = arith.constant 5.120000e+02 : f32
    %7 = vector.broadcast %cst_9 : f32 to vector<1x4x1xf32>
    %8 = arith.divf %6, %7 : vector<1x4x1xf32>
    %9 = vector.broadcast %8 : vector<1x4x1xf32> to vector<2x4x256xf32>
    %10 = arith.subf %0, %9 : vector<2x4x256xf32>
    %11 = arith.mulf %10, %10 : vector<2x4x256xf32>
    %cst_10 = arith.constant dense<0.000000e+00> : vector<4x256xf32>
    %12 = vector.multi_reduction <add>, %11, %cst_10 [0] : vector<2x4x256xf32> to vector<4x256xf32>
    %13 = vector.shape_cast %12 : vector<4x256xf32> to vector<1x4x256xf32>
    %cst_11 = arith.constant dense<0.000000e+00> : vector<1x4xf32>
    %14 = vector.multi_reduction <add>, %13, %cst_11 [2] : vector<1x4x256xf32> to vector<1x4xf32>
    %15 = vector.shape_cast %14 : vector<1x4xf32> to vector<1x4x1xf32>
    %cst_12 = arith.constant 5.110000e+02 : f32
    %16 = vector.broadcast %cst_12 : f32 to vector<1x4x1xf32>
    %17 = arith.divf %15, %16 : vector<1x4x1xf32>
    %cst_13 = arith.constant 1.000000e-10 : f32
    %18 = vector.broadcast %cst_13 : f32 to vector<1x4x1xf32>
    %19 = arith.addf %17, %18 : vector<1x4x1xf32>
    %20 = math.sqrt %19 : vector<1x4x1xf32>
    %cst_14 = arith.constant 3.000000e+00 : f32
    %21 = vector.broadcast %cst_14 : f32 to vector<1x4x1xf32>
    %22 = arith.mulf %21, %20 : vector<1x4x1xf32>
    %23 = math.absf %10 : vector<2x4x256xf32>
    %24 = vector.broadcast %22 : vector<1x4x1xf32> to vector<2x4x256xf32>
    %25 = arith.cmpf olt, %23, %24 : vector<2x4x256xf32>
    %cst_15 = arith.constant 0.000000e+00 : f32
    %26 = vector.broadcast %cst_15 : f32 to vector<2x4x256xf32>
    %27 = arith.select %25, %10, %26 : vector<2x4x256xi1>, vector<2x4x256xf32>
    %28 = arith.extui %25 : vector<2x4x256xi1> to vector<2x4x256xi32>
    %29 = arith.sitofp %28 : vector<2x4x256xi32> to vector<2x4x256xf32>
    %cst_16 = arith.constant dense<0.000000e+00> : vector<4x256xf32>
    %30 = vector.multi_reduction <add>, %29, %cst_16 [0] : vector<2x4x256xf32> to vector<4x256xf32>
    %31 = vector.shape_cast %30 : vector<4x256xf32> to vector<1x4x256xf32>
    %cst_17 = arith.constant dense<0.000000e+00> : vector<1x4xf32>
    %32 = vector.multi_reduction <add>, %31, %cst_17 [2] : vector<1x4x256xf32> to vector<1x4xf32>
    %33 = vector.shape_cast %32 : vector<1x4xf32> to vector<1x4x1xf32>
    %cst_18 = arith.constant dense<0.000000e+00> : vector<4x256xf32>
    %34 = vector.multi_reduction <add>, %27, %cst_18 [0] : vector<2x4x256xf32> to vector<4x256xf32>
    %35 = vector.shape_cast %34 : vector<4x256xf32> to vector<1x4x256xf32>
    %cst_19 = arith.constant dense<0.000000e+00> : vector<1x4xf32>
    %36 = vector.multi_reduction <add>, %35, %cst_19 [2] : vector<1x4x256xf32> to vector<1x4xf32>
    %37 = vector.shape_cast %36 : vector<1x4xf32> to vector<1x4x1xf32>
    %38 = arith.mulf %27, %10 : vector<2x4x256xf32>
    %cst_20 = arith.constant dense<0.000000e+00> : vector<4x256xf32>
    %39 = vector.multi_reduction <add>, %38, %cst_20 [0] : vector<2x4x256xf32> to vector<4x256xf32>
    %40 = vector.shape_cast %39 : vector<4x256xf32> to vector<1x4x256xf32>
    %cst_21 = arith.constant dense<0.000000e+00> : vector<1x4xf32>
    %41 = vector.multi_reduction <add>, %40, %cst_21 [2] : vector<1x4x256xf32> to vector<1x4xf32>
    %42 = vector.shape_cast %41 : vector<1x4xf32> to vector<1x4x1xf32>
    %cst_22 = arith.constant 1.000000e+00 : f32
    %43 = vector.broadcast %cst_22 : f32 to vector<1x4x1xf32>
    %44 = arith.maximumf %33, %43 : vector<1x4x1xf32>
    %45 = arith.divf %37, %44 : vector<1x4x1xf32>
    %46 = arith.divf %42, %44 : vector<1x4x1xf32>
    %47 = arith.mulf %45, %45 : vector<1x4x1xf32>
    %48 = arith.subf %46, %47 : vector<1x4x1xf32>
    %cst_23 = arith.constant 0.000000e+00 : f32
    %49 = vector.broadcast %cst_23 : f32 to vector<1x4x1xf32>
    %50 = arith.maximumf %48, %49 : vector<1x4x1xf32>
    %51 = arith.addf %8, %45 : vector<1x4x1xf32>
    %cst_24 = arith.constant 9.99999968E-21 : f32
    %52 = vector.broadcast %cst_24 : f32 to vector<1x4x1xf32>
    %53 = arith.addf %50, %52 : vector<1x4x1xf32>
    %54 = math.rsqrt %53 : vector<1x4x1xf32>
    %55 = arith.mulf %1, %54 : vector<1x4x1xf32>
    %56 = arith.mulf %51, %55 : vector<1x4x1xf32>
    %57 = arith.subf %2, %56 : vector<1x4x1xf32>
    %58 = vector.broadcast %55 : vector<1x4x1xf32> to vector<2x4x256xf32>
    %59 = arith.mulf %0, %58 : vector<2x4x256xf32>
    %60 = vector.broadcast %57 : vector<1x4x1xf32> to vector<2x4x256xf32>
    %61 = arith.addf %59, %60 : vector<2x4x256xf32>
    %c0_25 = arith.constant 0 : index
    %c0_26 = arith.constant 0 : index
    %c0_27 = arith.constant 0 : index
    %62 = vector.load %arg4[%c0_25, %c0_26, %c0_27] : memref<2x4x256xf32, #tpu.memory_space<vmem>>, vector<2x4x256xf32>
    tpu.vector_store %arg4[%c0_25, %c0_26, %c0_27], %61 {strides = array<i32>} : memref<2x4x256xf32, #tpu.memory_space<vmem>>, vector<2x4x256xf32>,
    return
  }
  func.func @transform_0(%arg0: i32) -> (i32, i32, i32) {
    %c0_i32 = arith.constant 0 : i32
    %c0_i32_0 = arith.constant 0 : i32
    %c0_i32_1 = arith.constant 0 : i32
    return %c0_i32, %arg0, %c0_i32_0 : i32, i32, i32
  }
  func.func @transform_1(%arg0: i32) -> (i32, i32, i32) {
    %c0_i32 = arith.constant 0 : i32
    %c0_i32_0 = arith.constant 0 : i32
    %c0_i32_1 = arith.constant 0 : i32
    return %c0_i32, %arg0, %c0_i32_0 : i32, i32, i32
  }
  func.func @transform_2(%arg0: i32) -> (i32, i32, i32) {
    %c0_i32 = arith.constant 0 : i32
    %c0_i32_0 = arith.constant 0 : i32
    %c0_i32_1 = arith.constant 0 : i32
    return %c0_i32, %arg0, %c0_i32_0 : i32, i32, i32
  }
  func.func @transform_3(%arg0: i32) -> (i32, i32, i32) {
    %c0_i32 = arith.constant 0 : i32
    %c0_i32_0 = arith.constant 0 : i32
    %c0_i32_1 = arith.constant 0 : i32
    return %c0_i32, %arg0, %c0_i32_0 : i32, i32, i32
  }
}

</mosaic_0001>

<bundles_post_ra>
// kernel: tpu_custom_call.1
= control target key start
LH: loop header
LB: loop body
LE: loop exit
PB: predicated region body
PF: predicated region fallthrough
CT: control target
= control target key end

     0   :  { %8 = vsyncpa [#allocation3], 0  ;;  %s410_s0 = inlined_call_operand.hbm [shape: f32[2,4,256], index: 0, kind: input, shape index: {}]   ;;  %s411_s1 = inlined_call_operand.vmem [shape: f32[1,4,1], index: 1, kind: input, shape index: {}]   ;;  %s412_s2 = inlined_call_operand.vmem [shape: f32[1,4,1], index: 2, kind: input, shape index: {}]   ;;  %s413_s3 = inlined_call_operand.hbm [shape: f32[2,4,256], index: 3, kind: output, shape index: {}]  }
   0x1   :  { %9 = vsyncpa [#allocation4], 0  ;;  %s293_s12 = smov [#allocation2]   ;;  %s245_s16 = scalar_lea.hbm %s410_s0, 256 }
   0x2   :  { %s15_s13 = sshll.u32 %s293_s12, 4  ;;  %p246_p0 = scmp.ne.s32.totalorder %s410_s0, %s245_s16  ;;  %s16_s13 = int_to_ptr.vmem [resolvable:$true] %s15_s13 }
   0x3   :  { %p249_p1 = scmp.lt.u32.totalorder %s245_s16, %s410_s0 }
   0x5   :  { %p251_p2 = pnand %p249_p1, %p246_p0 }
   0x7   :  { %254 = shalt.err (!%p251_p2)
}
   0x8   :  { %s255_s21 = scalar_lea.vmem %s16_s13, 256  ;;  %p260_p4 = scmp.lt.s32.totalorder %s16_s13, %s16_s13 }
   0x9   :  { %p256_p3 = scmp.ne.s32.totalorder %s16_s13, %s255_s21  ;;  %p261_p5 = scmp.lt.s32.totalorder %s255_s21, %s255_s21 }
   0xb   :  { %p262_p6 = por %p261_p5, %p260_p4 }
   0xd   :  { %p263_p7 = pnand %p262_p6, %p256_p3 }
   0xf   :  { %266 = shalt.err (!%p263_p7)
}
  0x10   :  { %s294_s22 = smov 128   ;;  %s295_s23 = smov 8  }
  0x11   :  { %21 = dma.hbm_to_vmem [thread:$0]  %s410_s0, 256, %s16_s13, [#allocation3], %s294_s22, %s294_s22, %s295_s23  }
  0x12   :  { %289 = dma.done.wait [#allocation3], 256  }
  0x13   :  { %290 = vsyncadd [#allocation3], 4294967040  ;;  %vm39_vm0 = vcmask 1043456   ;;  %v335_v0 = vld [vmem:[#allocation2] sm:$0xff]  ;;  %v337_v1 = vld [vmem:[#allocation2 + $0x8] sm:$0xff]  ;;  %v57_v15 = vlaneseq  ;;  %v297_v50 = vmov 0.0  }
  0x14   :  { %v35_v2 = vcombine.high %v335_v0, %v335_v0  ;;  %v36_v3 = vcombine.high %v337_v1, %v337_v1  ;;  %v40_v4 = vsel %vm39_vm0, %v335_v0, 0.0  ;;  %v41_v5 = vsel %vm39_vm0, %v337_v1, 0.0  ;;  %s299_s29 = smov [#allocation5]  }
  0x15   :  { %v42_v6 = vadd.f32 %v41_v5, %v40_v4  ;;  %v296_v13 = vmov 839922192   ;;  %v58_v17 = vshrl.u32 %v57_v15, 7  ;;  %s214_s30 = sshll.u32 %s299_s29, 4  ;;  %s215_s30 = int_to_ptr.vmem [resolvable:$true] %s214_s30 }
  0x16   :  { %v43_v7 = vsel %vm39_vm0, %v35_v2, 0.0  ;;  %v44_v8 = vsel %vm39_vm0, %v36_v3, 0.0  ;;  %v55_v14 = vunpack.c.l.s4 %v296_v13  ;;  %p272_p9 = scmp.lt.s32.totalorder %s215_s30, %s215_s30 }
  0x17   :  { %v45_v9 = vadd.f32 %v44_v8, %v43_v7  ;;  %v46_v10 = vsel %vm39_vm0, %v42_v6, 0.0 }
  0x18   :  { %v56_v16 = vunpack.c.0.s8 %v55_v14 }
  0x19   :  { %v47_v11 = vsel %vm39_vm0, %v45_v9, 0.0 }
  0x1a   :  { %v48_v12 = vadd.f32 %v47_v11, %v46_v10  ;;  %v351_v18 = vsub.s32 %v56_v16, %v58_v17 }
  0x1c   :  { %49 = vadd.xlane.f32.xlu0 %v48_v12 }
  0xa9   :  { %v50_v19 = vpop.xlane.xlu0 %49 }
  0xaa   :  { %v353_v20 = vmul.f32 0.001953125, %v50_v19 }
  0xac   :  { %v60_v21 = vrot.slane %v353_v20, %v351_v18 }
  0xae   :  { %v62_v22 = vsub.f32 %v335_v0, %v60_v21  ;;  %v63_v23 = vsub.f32 %v337_v1, %v60_v21 }
  0xb0   :  { %v64_v24 = vmul.f32 %v62_v22, %v62_v22  ;;  %v65_v25 = vmul.f32 %v63_v23, %v63_v23  ;;  %v94_v46 = vand.u32 2147483647, %v62_v22  ;;  %v95_v47 = vand.u32 2147483647, %v63_v23 }
  0xb2   :  { %v68_v26 = vcombine.high %v64_v24, %v64_v24  ;;  %v69_v27 = vcombine.high %v65_v25, %v65_v25  ;;  %v72_v28 = vsel %vm39_vm0, %v64_v24, 0.0  ;;  %v73_v29 = vsel %vm39_vm0, %v65_v25, 0.0 }
  0xb3   :  { %v74_v30 = vadd.f32 %v73_v29, %v72_v28  ;;  %v298_v29 = vmov 0  }
  0xb4   :  { %v75_v31 = vsel %vm39_vm0, %v68_v26, 0.0  ;;  %v76_v32 = vsel %vm39_vm0, %v69_v27, 0.0  ;;  %235 = vset.pattern.permute.xlu1 %v298_v29  ;;  %236 = vset.pattern.permute.xlu0 %v298_v29 }
  0xb5   :  { %v77_v33 = vadd.f32 %v76_v32, %v75_v31  ;;  %v78_v34 = vsel %vm39_vm0, %v74_v30, 0.0 }
  0xb7   :  { %v79_v35 = vsel %vm39_vm0, %v77_v33, 0.0 }
  0xb8   :  { %v80_v36 = vadd.f32 %v79_v35, %v78_v34 }
  0xba   :  { %81 = vadd.xlane.f32.xlu0 %v80_v36 }
 0x147   :  { %v82_v37 = vpop.xlane.xlu0 %81 }
 0x148   :  { %v84_v38 = vmul.f32 0.0019569471, %v82_v37 }
 0x14a   :  { %v85_v39 = vadd.f32 1e-10, %v84_v38 }
 0x14c   :  { %239 = vrsqrt.f32 %v85_v39  ;;  %vm88_vm1 = vcmp.eq.f32.partialorder %v85_v39, inf  ;;  %v91_v42 = vand.u32 2147483648, %v85_v39  ;;  %vm90_vm2 = vcmp.eq.f32.partialorder %v85_v39, 0.0 }
 0x156   :  { %v240_v40 = vpop.eup %239 }
 0x157   :  { %v87_v41 = vmul.f32 %v240_v40, %v85_v39 }
 0x159   :  { %v89_v43 = vsel %vm88_vm1, %v85_v39, %v87_v41  ;;  %v31_v41 = vld [vmem:[%s411_s1] sm:$0xf]  ;;  %s267_s1 = scalar_lea.vmem %s215_s30, 256 }
 0x15a   :  { %v92_v44 = vsel %vm90_vm2, %v91_v42, %v89_v43  ;;  %p268_p8 = scmp.ne.s32.totalorder %s215_s30, %s267_s1  ;;  %p273_p10 = scmp.lt.s32.totalorder %s267_s1, %s267_s1 }
 0x15b   :  { %v93_v45 = vmul.f32 3.0, %v92_v44 }
 0x15c   :  { %p274_p11 = por %p273_p10, %p272_p9 }
 0x15d   :  { %v103_v48 = vrot.slane %v93_v45, %v351_v18  ;;  %v32_v45 = vld [vmem:[%s412_s2] sm:$0xf] }
 0x15e   :  { %p275_p12 = pnand %p274_p11, %p268_p8 }
 0x15f   :  { %vm105_vm3 = vcmp.lt.f32.partialorder %v94_v46, %v103_v48  ;;  %vm106_vm4 = vcmp.lt.f32.partialorder %v95_v47, %v103_v48 }
 0x160   :  { %v108_v49 = vsel %vm106_vm4, %v63_v23, 0.0  ;;  %v226_v51 = vsel %vm105_vm3, 1.0, %v297_v50  ;;  %v227_v52 = vsel %vm106_vm4, 1.0, %v297_v50  ;;  %v107_v53 = vsel %vm105_vm3, %v62_v22, 0.0 }
 0x161   :  { %v115_v54 = vcombine.high %v226_v51, %v226_v51  ;;  %v116_v55 = vcombine.high %v227_v52, %v227_v52  ;;  %v119_v56 = vsel %vm39_vm0, %v226_v51, 0.0  ;;  %v120_v57 = vsel %vm39_vm0, %v227_v52, 0.0 }
 0x162   :  { %v121_v58 = vadd.f32 %v120_v57, %v119_v56  ;;  %v147_v59 = vmul.f32 %v107_v53, %v62_v22  ;;  %v148_v60 = vmul.f32 %v108_v49, %v63_v23  ;;  %v132_v61 = vcombine.high %v107_v53, %v107_v53 }
 0x163   :  { %v122_v62 = vsel %vm39_vm0, %v115_v54, 0.0  ;;  %v123_v63 = vsel %vm39_vm0, %v116_v55, 0.0  ;;  %v133_v2 = vcombine.high %v108_v49, %v108_v49  ;;  %v136_v3 = vsel %vm39_vm0, %v107_v53, 0.0 }
 0x164   :  { %v124_v4 = vadd.f32 %v123_v63, %v122_v62  ;;  %v125_v5 = vsel %vm39_vm0, %v121_v58, 0.0  ;;  %v151_v6 = vcombine.high %v147_v59, %v147_v59  ;;  %v152_v7 = vcombine.high %v148_v60, %v148_v60 }
 0x165   :  { %v155_v8 = vsel %vm39_vm0, %v147_v59, 0.0  ;;  %v156_v9 = vsel %vm39_vm0, %v148_v60, 0.0  ;;  %v137_v10 = vsel %vm39_vm0, %v108_v49, 0.0  ;;  %v139_v11 = vsel %vm39_vm0, %v132_v61, 0.0 }
 0x166   :  { %v126_v12 = vsel %vm39_vm0, %v124_v4, 0.0  ;;  %v157_v13 = vadd.f32 %v156_v9, %v155_v8  ;;  %v158_v14 = vsel %vm39_vm0, %v151_v6, 0.0  ;;  %v159_v15 = vsel %vm39_vm0, %v152_v7, 0.0 }
 0x167   :  { %v127_v16 = vadd.f32 %v126_v12, %v125_v5  ;;  %v160_v17 = vadd.f32 %v159_v15, %v158_v14  ;;  %v138_v19 = vadd.f32 %v137_v10, %v136_v3  ;;  %v140_v21 = vsel %vm39_vm0, %v133_v2, 0.0 }
 0x168   :  { %v141_v22 = vadd.f32 %v140_v21, %v139_v11  ;;  %v161_v23 = vsel %vm39_vm0, %v157_v13, 0.0 }
 0x169   :  { %128 = vadd.xlane.f32.xlu1 %v127_v16  ;;  %v162_v24 = vsel %vm39_vm0, %v160_v17, 0.0  ;;  %v142_v26 = vsel %vm39_vm0, %v138_v19, 0.0 }
 0x16a   :  { %v163_v25 = vadd.f32 %v162_v24, %v161_v23  ;;  %v143_v27 = vsel %vm39_vm0, %v141_v22, 0.0 }
 0x16b   :  { %v144_v28 = vadd.f32 %v143_v27, %v142_v26 }
 0x16c   :  { %164 = vadd.xlane.f32.xlu0 %v163_v25 }
 0x16d   :  { %145 = vadd.xlane.f32.xlu1 %v144_v28 }
 0x1f6   :  { %v129_v30 = vpop.xlane.xlu1 %128 }
 0x1f7   :  { %v166_v31 = vmax.f32 %v129_v30, 1.0 }
 0x1f9   :  { %241 = vrcp.f32 %v166_v31  ;;  %v165_v35 = vpop.xlane.xlu0 %164 }
 0x1fa   :  { %v146_v33 = vpop.xlane.xlu1 %145 }
 0x203   :  { %v242_v32 = vpop.eup %241 }
 0x204   :  { %v168_v34 = vmul.f32 %v242_v32, %v146_v33  ;;  %v169_v36 = vmul.f32 %v242_v32, %v165_v35 }
 0x206   :  { %v170_v37 = vmul.f32 %v168_v34, %v168_v34  ;;  %v173_v43 = vadd.f32 %v168_v34, %v353_v20 }
 0x208   :  { %v171_v38 = vsub.f32 %v169_v36, %v170_v37 }
 0x20a   :  { %v172_v39 = vmax.f32 %v171_v38, 0.0 }
 0x20c   :  { %v174_v40 = vadd.f32 1e-20, %v172_v39 }
 0x20e   :  { %243 = vrsqrt.f32 %v174_v40 }
 0x218   :  { %v244_v42 = vpop.eup %243 }
 0x219   :  { %v176_v44 = vmul.f32 %v244_v42, %v31_v41 }
 0x21b   :  { %181 = vperm.xlu1 %235, %v176_v44   ;;  %v177_v46 = vmul.f32 %v176_v44, %v173_v43 }
 0x21d   :  { %v178_v47 = vsub.f32 %v32_v45, %v177_v46 }
 0x21f   :  { %195 = vperm.xlu0 %236, %v178_v47  }
 0x29a   :  { %v182_v48 = vpop.permute.xlu1 %181 }
 0x29b   :  { %v189_v49 = vrot.slane %v182_v48, %v351_v18 }
 0x29d   :  { %v191_v51 = vmul.f32 %v189_v49, %v335_v0  ;;  %v192_v52 = vmul.f32 %v189_v49, %v337_v1 }
 0x29e   :  { %v196_v50 = vpop.permute.xlu0 %195 }
 0x29f   :  { %v203_v20 = vrot.slane %v196_v50, %v351_v18 }
 0x2a1   :  { %v205_v53 = vadd.f32 %v203_v20, %v191_v51  ;;  %v206_v54 = vadd.f32 %v203_v20, %v192_v52 }
 0x2a3   :  { %207 = vst [vmem:[#allocation5] sm:$0xff] %v205_v53  ;;  %208 = vst [vmem:[#allocation5 + $0x8] sm:$0xff] %v206_v54 }
 0x2a4   :  { %278 = shalt.err (!%p275_p12)
}
 0x2a5   :  { %s279_s5 = scalar_lea.hbm %s413_s3, 256 }
 0x2a6   :  { %p280_p13 = scmp.ne.s32.totalorder %s413_s3, %s279_s5  ;;  %p283_p0 = scmp.lt.u32.totalorder %s279_s5, %s413_s3 }
 0x2a8   :  { %p285_p1 = pnand %p283_p0, %p280_p13 }
 0x2aa   :  { %288 = shalt.err (!%p285_p1)
}
 0x2ab   :  { %220 = dma.vmem_to_hbm [thread:$0]  %s215_s30, 256, %s413_s3, [#allocation4], %s294_s22, %s294_s22, %s295_s23  }
 0x2ac   :  { %291 = dma.done.wait [#allocation4], 256  }
 0x2ad   :  { %292 = vsyncadd [#allocation4], 4294967040 }
 0x2ae   :  { %224 = vsyncpa [#allocation3], 1 }
 0x2af   :  { %225 = vsyncpa [#allocation4], 1 }

</bundles_post_ra>
